<compile_context>
chip_gen: v7x
topology: tpu7x:2x2x1
jax: 0.10.0
libtpu: 0.0.40
codegen_flags: <defaults>
</compile_context>

<pallas_src>
import math

import jax
import jax.numpy as jnp
from jax.experimental import pallas as pl
from jax.experimental.pallas import tpu as pltpu


def _round_up(x, m):
    return ((x + m - 1) // m) * m


def _decoder_pred_kernel(x_ref, w_ref, b_ref, o_ref):
    """clamp(x @ W + b, 0, 1) for one row tile.

    x_ref: (tm, width)        VMEM bf16
    w_ref: (width, out_pad)   VMEM bf16 (resident across the grid)
    b_ref: (1, out_pad)       VMEM f32
    o_ref: (tm, out_pad)      VMEM f32
    """
    y = jnp.dot(x_ref[...], w_ref[...], preferred_element_type=jnp.float32)
    y = y + b_ref[...]
    o_ref[...] = jnp.clip(y, 0.0, 1.0).astype(o_ref.dtype)


def decoder_pred_pallas(x2d, w, b, *, tm=512):
    """x2d: (R, width) f32, w: (width, out_dim), b: (out_dim,) -> (R, out_dim) f32."""
    R, width = x2d.shape
    out_dim = w.shape[1]

    # --- lane-pad output features to a multiple of 128 ---------------------
    out_pad = _round_up(out_dim, 128)
    if out_pad != out_dim:
        w = jnp.pad(w, ((0, 0), (0, out_pad - out_dim)))
        b = jnp.pad(b, (0, out_pad - out_dim))          # zero bias -> pads clamp to 0
    b2d = b.reshape(1, out_pad).astype(jnp.float32)

    # --- bf16 inputs on the MXU, f32 accumulation ---------------------------
    x_bf = x2d.astype(jnp.bfloat16)
    w_bf = w.astype(jnp.bfloat16)

    # --- choose row tile: large, sublane friendly, >=2 grid steps if possible
    tm = max(16, min(tm, _round_up(R, 16)))
    if R >= 32:
        # keep at least 2 grid steps so the row axis can shard across 2 TCs (v7x)
        tm = min(tm, _round_up(-(-R // 2), 16))
    tm = _round_up(tm, 16)

    R_pad = _round_up(R, tm)
    if R_pad != R:
        x_bf = jnp.pad(x_bf, ((0, R_pad - R), (0, 0)))

    grid = (R_pad // tm,)
    flops = 2 * R_pad * width * out_pad
    bytes_accessed = (x_bf.size * 2 + w_bf.size * 2 + b2d.size * 4
                      + R_pad * out_pad * 4)

    y = pl.pallas_call(
        _decoder_pred_kernel,
        out_shape=jax.ShapeDtypeStruct((R_pad, out_pad), jnp.float32),
        grid_spec=pltpu.PrefetchScalarGridSpec(
            num_scalar_prefetch=0,
            grid=grid,
            in_specs=[
                pl.BlockSpec((tm, width), lambda i: (i, 0)),
                pl.BlockSpec((width, out_pad), lambda i: (0, 0)),
                pl.BlockSpec((1, out_pad), lambda i: (0, 0)),
            ],
            out_specs=pl.BlockSpec((tm, out_pad), lambda i: (i, 0)),
        ),
        compiler_params=pltpu.CompilerParams(
            dimension_semantics=("parallel",)),
        cost_estimate=pl.CostEstimate(
            flops=flops, transcendentals=0, bytes_accessed=bytes_accessed),
    )(x_bf, w_bf, b2d)

    return y[:R, :out_dim]


def unpatchify_img(x, patch_size):
    """x: (B, L, p*p*3) -> (B, 3, H, W), standard MAE unpatchify (NCHW)."""
    B, L, _ = x.shape
    p = patch_size
    h = w = int(math.isqrt(L))
    assert h * w == L, "patch_num must be a perfect square"
    x = x.reshape(B, h, w, p, p, 3)
    # einsum 'nhwpqc -> nchpwq'
    x = jnp.transpose(x, (0, 5, 1, 3, 2, 4))
    return x.reshape(B, 3, h * p, w * p)


class ImgReconPallas:
    """JAX/Pallas equivalent of the PyTorch img_recon module."""

    def __init__(self, width=512, img_size=32, patch_size_img=8, key=None):
        self.width = width
        self.patch_size_img = patch_size_img
        self.patch_num = (img_size // patch_size_img) ** 2
        self.out_dim = patch_size_img ** 2 * 3

        if key is None:
            key = jax.random.PRNGKey(1)
        kw, kb = jax.random.split(key)
        # Deterministic synthetic init (shapes match nn.Linear(width, p*p*3)).
        # PyTorch stores weight as (out, in); we keep (in, out) for x @ W.
        bound = 1.0 / math.sqrt(width)
        self.w = jax.random.uniform(
            kw, (width, self.out_dim), jnp.float32, -bound, bound)
        self.b = jax.random.uniform(
            kb, (self.out_dim,), jnp.float32, -bound, bound)

    def __call__(self, x, *, tm=512):
        # x: (B, L, width) float32
        B, L, W = x.shape
        assert W == self.width
        x2d = x.reshape(B * L, W)
        y2d = decoder_pred_pallas(x2d, self.w, self.b, tm=tm)
        y = y2d.reshape(B, L, self.out_dim)
        return unpatchify_img(y, self.patch_size_img)


def _reference(x, w, b, patch_size):
    # Mirrors the kernel's bf16-input / f32-accumulate numerics.
    y = jnp.dot(x.astype(jnp.bfloat16), w.astype(jnp.bfloat16),
                preferred_element_type=jnp.float32) + b
    y = jnp.clip(y, 0.0, 1.0)
    return unpatchify_img(y, patch_size)


if __name__ == "__main__":
    # Small shapes consistent with the forward:
    #   width=32, img_size=16, patch_size_img=4 -> patch_num L = 16, out_dim = 48
    B, width, img_size, patch_size = 2, 32, 16, 4
    L = (img_size // patch_size) ** 2  # 16

    model = ImgReconPallas(width=width, img_size=img_size,
                           patch_size_img=patch_size,
                           key=jax.random.PRNGKey(1))

    x = jax.random.normal(jax.random.PRNGKey(0), (B, L, width), jnp.float32)

    out = model(x)
    out = jax.block_until_ready(out)

    assert out.shape == (B, 3, img_size, img_size), out.shape

    ref = _reference(x, model.w, model.b, patch_size)
    max_err = float(jnp.max(jnp.abs(out - ref)))
    assert max_err < 1e-3, max_err

    print("KERNEL_OK")
</pallas_src>

<mosaic_0001>
module attributes {stable_mosaic.version = 11 : i64} {
  func.func @_decoder_pred_kernel(%arg0: i32, %arg1: memref<16x32xbf16, #tpu.memory_space<vmem>>, %arg2: memref<32x128xbf16, #tpu.memory_space<vmem>>, %arg3: memref<1x128xf32, #tpu.memory_space<vmem>>, %arg4: memref<16x128xf32, #tpu.memory_space<vmem>>) attributes {dimension_semantics = [#tpu.dimension_semantics<parallel>], iteration_bounds = array<i64: 2>, scalar_prefetch = 0 : i64, scratch_operands = 0 : i64, tpu.core_type = #tpu.core_type<tc>, window_params = [{transform_indices = @transform_0, window_bounds = array<i64: 16, 32>}, {pipeline_mode = #tpu.pipeline_mode<synchronous>, transform_indices = @transform_1, window_bounds = array<i64: 32, 128>}, {pipeline_mode = #tpu.pipeline_mode<synchronous>, transform_indices = @transform_2, window_bounds = array<i64: 1, 128>}, {transform_indices = @transform_3, window_bounds = array<i64: 16, 128>}]} {
    %c0 = arith.constant 0 : index
    %c0_0 = arith.constant 0 : index
    %0 = vector.load %arg1[%c0, %c0_0] : memref<16x32xbf16, #tpu.memory_space<vmem>>, vector<16x32xbf16>
    %c0_1 = arith.constant 0 : index
    %c0_2 = arith.constant 0 : index
    %1 = vector.load %arg2[%c0_1, %c0_2] : memref<32x128xbf16, #tpu.memory_space<vmem>>, vector<32x128xbf16>
    %cst = arith.constant dense<0.000000e+00> : vector<16x128xf32>
    %2 = tpu.matmul %0, %1, %cst {dimension_numbers = #tpu.dot_dimension_numbers<[1], [0], [0], [1], [0, 0, 1, 1], [], []>} : vector<16x32xbf16>, vector<32x128xbf16>, vector<16x128xf32> -> vector<16x128xf32>
    %c0_3 = arith.constant 0 : index
    %c0_4 = arith.constant 0 : index
    %3 = vector.load %arg3[%c0_3, %c0_4] : memref<1x128xf32, #tpu.memory_space<vmem>>, vector<1x128xf32>
    %4 = vector.broadcast %3 : vector<1x128xf32> to vector<16x128xf32>
    %5 = arith.addf %2, %4 : vector<16x128xf32>
    %cst_5 = arith.constant 0.000000e+00 : f32
    %cst_6 = arith.constant 1.000000e+00 : f32
    %6 = vector.broadcast %cst_5 : f32 to vector<16x128xf32>
    %7 = arith.maximumf %6, %5 : vector<16x128xf32>
    %8 = vector.broadcast %cst_6 : f32 to vector<16x128xf32>
    %9 = arith.minimumf %8, %7 : vector<16x128xf32>
    %c0_7 = arith.constant 0 : index
    %c0_8 = arith.constant 0 : index
    %10 = vector.load %arg4[%c0_7, %c0_8] : memref<16x128xf32, #tpu.memory_space<vmem>>, vector<16x128xf32>
    tpu.vector_store %arg4[%c0_7, %c0_8], %9 {strides = array<i32>} : memref<16x128xf32, #tpu.memory_space<vmem>>, vector<16x128xf32>,
    return
  }
  func.func @transform_0(%arg0: i32) -> (i32, i32) {
    %c0_i32 = arith.constant 0 : i32
    %c0_i32_0 = arith.constant 0 : i32
    return %arg0, %c0_i32 : i32, i32
  }
  func.func @transform_1(%arg0: i32) -> (i32, i32) {
    %c0_i32 = arith.constant 0 : i32
    %c0_i32_0 = arith.constant 0 : i32
    %c0_i32_1 = arith.constant 0 : i32
    return %c0_i32, %c0_i32_0 : i32, i32
  }
  func.func @transform_2(%arg0: i32) -> (i32, i32) {
    %c0_i32 = arith.constant 0 : i32
    %c0_i32_0 = arith.constant 0 : i32
    %c0_i32_1 = arith.constant 0 : i32
    return %c0_i32, %c0_i32_0 : i32, i32
  }
  func.func @transform_3(%arg0: i32) -> (i32, i32) {
    %c0_i32 = arith.constant 0 : i32
    %c0_i32_0 = arith.constant 0 : i32
    return %arg0, %c0_i32 : i32, i32
  }
}

</mosaic_0001>

<bundles_post_ra>
// kernel: tpu_custom_call.1
= control target key start
LH: loop header
LB: loop body
LE: loop exit
PB: predicated region body
PF: predicated region fallthrough
CT: control target
= control target key end

     0   :  { %8 = vsyncpa [#allocation3], 0  ;;  %s855_s0 = inlined_call_operand.hbm [shape: bf16[32,32], index: 0, kind: input, shape index: {}]   ;;  %s856_s1 = inlined_call_operand.hbm [shape: bf16[32,128], index: 1, kind: input, shape index: {}]   ;;  %s857_s2 = inlined_call_operand.vmem [shape: f32[1,128], index: 2, kind: input, shape index: {}]   ;;  %s858_s3 = inlined_call_operand.hbm [shape: f32[32,128], index: 3, kind: output, shape index: {}]  }
   0x1   :  { %10 = vsyncpa [#allocation3 + $0x1], 0 }
   0x2   :  { %11 = vsyncpa [#allocation6], 0 }
   0x3   :  { %12 = vsyncpa [#allocation4], 0 }
   0x4   :  { %14 = vsyncpa [#allocation4 + $0x1], 0  ;;  %s644_s12 = smov 0   ;;  %s646_s13 = smov 0  }
   0x5   :  { %s648_s14 = smov 0   ;;  %s650_s15 = smov 0  }
   0x6 LB: > { %s665_s16 = sadd.s32 4294967295, %s613_s15   ;;  %s385_s17 = sadd.s32 4294967294, %s613_s15   ;;  %s613_s15 = sphi %s650_s15, %s878_s15   ;;  %s609_s14 = sphi %s648_s14, %s877_s14   ;;  %s605_s13 = sphi %s646_s13, %s876_s13   ;;  %s601_s12 = sphi %s644_s12, %s875_s12  }
   0x7   : > { %p40_p0 = scmp.ne.s32.totalorder %s605_s13, %s601_s12  ;;  %p859_p1 = scmp.eq.s32.totalorder %s665_s16, 0 }
   0x8   : > { %p112_p3 = scmp.eq.s32.totalorder %s385_s17, 1  ;;  %p386_p5 = scmp.ge.s32.totalorder %s613_s15, 1 }
   0x9   : > { %p674_p4 = por %p859_p1, %p40_p0  ;;  %p119_p7 = scmp.lt.s32.totalorder %s613_s15, 3 }
   0xa   : > { %p679_p6 = por %p112_p3, %p40_p0  ;;  %s615_s21 = smov [#allocation5]  }
   0xb   : > { %s862_s18 = scalar_select %p674_p4, 1, 0 }
   0xc   : > { %s863_s19 = scalar_select %p679_p6, 1, 0 }
   0xd   : > { %p684_p8 = pnand %p386_p5, %p119_p7  ;;  %s131_s22 = sshll.u32 %s615_s21, 4  ;;  %s688_s22 = int_to_ptr.vmem [resolvable:$true] %s131_s22 }
   0xe   : > { %s700_s24 = sadd.s32 1, %s613_s15   ;;  %s27_s25 = sadd.s32 1, %s609_s14 }
   0xf   : > { %s864_s20 = scalar_select %p684_p8, 1, 0 }
  0x10   : > { %p427_p9 = pneg %p684_p8  ;;  %s24_s26 = ssub.s32 %s613_s15, %s700_s24 }
  0x11   : > { %s485_s29 = scalar_lea.hbm %s856_s1, 256 }
  0x12   : > { %p695_p11 = pnand %p427_p9, %p859_p1  ;;  %p486_p12 = scmp.ne.s32.totalorder %s856_s1, %s485_s29 }
  0x13   : > { %p492_p5 = scmp.lt.u32.totalorder %s485_s29, %s856_s1 }
  0x14   : > { %p487_p13 = pneg %p695_p11 }
  0x16   : > { %p488_p0 = pnand %p487_p13, %p486_p12 }
  0x18   : > { %p489_p3 = pneg %p488_p0 }
  0x1a   : > { %p494_p7 = pnand %p492_p5, %p489_p3 }
  0x1c   : > { %497 = shalt.err (!%p494_p7)
}
  0x1d   : > { %s498_s7 = scalar_lea.vmem %s688_s22, 256  ;;  %p506_p2 = scmp.lt.s32.totalorder %s688_s22, %s688_s22 }
  0x1e   : > { %p499_p9 = scmp.ne.s32.totalorder %s688_s22, %s498_s7  ;;  %p507_p6 = scmp.lt.s32.totalorder %s498_s7, %s498_s7 }
  0x20   : > { %p501_p10 = pnand %p499_p9, %p487_p13  ;;  %p508_p4 = por %p507_p6, %p506_p2 }
  0x22   : > { %p502_p1 = pneg %p501_p10 }
  0x24   : > { %p509_p8 = pnand %p508_p4, %p502_p1 }
  0x26   : > { %512 = shalt.err (!%p509_p8)
}
  0x27   : > { %s616_s8 = smov 64   ;;  %s617_s9 = smov 4  }
  0x28   : > { %430 = dma.hbm_to_vmem [thread:$0]  (!%p695_p11), %s856_s1, 256, %s688_s22, [#allocation6], %s616_s8, %s616_s8, %s617_s9  }
  0x29   : > { %p25_p1 = scmp.eq.s32.totalorder %s24_s26, 0  ;;  %p34_p2 = scmp.ne.s32.totalorder %s609_s14, %s605_s13 }
  0x2a   : > { %p35_p4 = scmp.eq.s32.totalorder %s613_s15, 0  ;;  %p440_p6 = scmp.lt.s32.totalorder %s613_s15, 2 }
  0x2b   : > { %s734_s17 = scalar_select %p25_p1, %s609_s14, %s27_s25  }
  0x2c   : > { %p36_p8 = por %p35_p4, %p34_p2  ;;  %p866_p10 = scmp.eq.s32.totalorder %s665_s16, 1 }
  0x2d   : > { %s148_s23 = sand.u32 1, %s609_s14   ;;  %s406_s27 = sshll.u32 %s613_s15, 7 }
  0x2e   : > { %p738_p12 = por %p866_p10, %p34_p2  ;;  %s389_s28 = sshll.u32 %s148_s23, 3 }
  0x2f   : > { %s747_s4 = scalar_lea.hbm %s855_s0, %s406_s27  ;;  %s152_s22 = scalar_lea.vmem [#allocation2], %s389_s28 }
  0x30   : > { %s159_s25 = sshll.u32 %s152_s22, 4  ;;  %p749_p11 = pnand %p440_p6, %p36_p8  ;;  %s753_s25 = int_to_ptr.vmem [resolvable:$true] %s159_s25 }
  0x31   : > { %s755_s5 = scalar_lea.sflag [#allocation3], %s148_s23  ;;  %s513_s6 = scalar_lea.hbm %s747_s4, 128 }
  0x32   : > { %p514_p13 = scmp.ne.s32.totalorder %s747_s4, %s513_s6  ;;  %p515_p0 = pneg %p749_p11 }
  0x33   : > { %s518_s11 = scalar_lea.hbm %s855_s0, 256  ;;  %p519_p7 = scmp.lt.u32.totalorder %s747_s4, %s855_s0 }
  0x34   : > { %p516_p3 = pnand %p515_p0, %p514_p13  ;;  %p520_p9 = scmp.lt.u32.totalorder %s518_s11, %s513_s6 }
  0x35   : > { %p522_p2 = scmp.lt.u32.totalorder %s513_s6, %s747_s4 }
  0x36   : > { %p517_p5 = pneg %p516_p3  ;;  %p521_p1 = por %p520_p9, %p519_p7 }
  0x38   : > { %p523_p4 = por %p522_p2, %p521_p1 }
  0x3a   : > { %p524_p6 = pnand %p523_p4, %p517_p5 }
  0x3c   : > { %527 = shalt.err (!%p524_p6)
}
  0x3d   : > { %s528_s23 = scalar_lea.vmem %s753_s25, 128  ;;  %s618_s29 = smov [#allocation2]  }
  0x3e   : > { %p529_p8 = scmp.ne.s32.totalorder %s753_s25, %s528_s23  ;;  %s533_s30 = sshll.u32 %s618_s29, 4  ;;  %s534_s30 = int_to_ptr.vmem [resolvable:$false] %s533_s30 }
  0x3f   : > { %s535_s22 = scalar_lea.vmem %s534_s30, 256  ;;  %p536_p3 = scmp.lt.s32.totalorder %s753_s25, %s534_s30 }
  0x40   : > { %p531_p10 = pnand %p529_p8, %p515_p0  ;;  %p537_p7 = scmp.lt.s32.totalorder %s535_s22, %s528_s23 }
  0x42   : > { %p532_p13 = pneg %p531_p10  ;;  %p538_p9 = por %p537_p7, %p536_p3 }
  0x44   : > { %p539_p1 = pnand %p538_p9, %p532_p13 }
  0x46   : > { %542 = shalt.err (!%p539_p1)
}
  0x47   : > { %434 = dma.hbm_to_vmem [thread:$0]  (!%p749_p11), %s747_s4, 128, %s753_s25, %s755_s5, %s616_s8, %s616_s8, %s617_s9  }
  0x48   : > { %p869_p0 = scmp.ne.s32.totalorder %s864_s20, 0 }
  0x49   : > { %s789_s6 = sand.u32 (!%p869_p0), 1, %s605_s13   ;;  %p870_p5 = scmp.ne.s32.totalorder (!%p869_p0), %s862_s18, 0 }
  0x4a   : > { %171 = sbr.rel (%p869_p0) target bundleno = 329 (0x149), region = 32  ;;  %s393_s7 = sshll.u32 (!%p869_p0), %s789_s6, 3 }
  0x4b   : > { %s174_s10 = scalar_lea.sflag (!%p869_p0), [#allocation3], %s789_s6  ;;  %s177_s11 = scalar_lea.vmem (!%p869_p0), [#allocation2], %s393_s7 }
  0x51   : > { %588 = dma.done.wait (%p870_p5), %s174_s10, 128  }
  0x52   : > { %590 = vsyncadd (%p870_p5), %s174_s10, 4294967168  ;;  %p871_p2 = scmp.eq.s32.totalorder %s665_s16, 0 }
  0x54   : > { %592 = dma.done.wait (%p871_p2), [#allocation6], 256   ;;  %p872_p11 = pmov %p871_p2 }
  0x55   : > { %v619_v0 = vmov 0.0   ;;  %vm620_vm0 = vmmov 0   ;;  %v482_v1 = vld [vmem:[#allocation5] sm:$0xff]   ;;  %v483_v2 = vld [vmem:[#allocation5 + $0x8] sm:$0xff]   ;;  %v484_v3 = vld [vmem:[%s177_s11] sm:$0xff]   ;;  %vm237_vm1 = vcmask 261120  }
  0x56   : > { %594 = vsyncadd (%p872_p11), [#allocation6], 4294967040  ;;  %411 = vmatprep.subr.bf16.mxu0 %v619_v0  ;;  %415 = vmatprep.mubr.msk.bf16.mxu0 %vm620_vm0, %v619_v0  ;;  %s395_s18 = sshll.u32 %s789_s6, 4  ;;  %v396_v4 = vld [vmem:[%s857_s2] ss:$0 sm:$0xff]  ;;  %s407_s25 = sshll.u32 %s665_s16, 8 }
  0x57   : > { %412 = vmatpush3.bf16.msra.mxu0 %v482_v1  ;;  %s203_s9 = scalar_lea.vmem [#allocation7], %s395_s18  ;;  %s811_s27 = scalar_lea.hbm %s858_s3, %s407_s25 }
  0x58   : > { %413 = vmatprep.subr.bf16.mxu0 %v619_v0  ;;  %s302_s4 = sshll.u32 %s203_s9, 4  ;;  %s289_s28 = scalar_lea.sflag [#allocation4], %s789_s6  ;;  %s806_s4 = int_to_ptr.vmem [resolvable:$true] %s302_s4 }
  0x59   : > { %s543_s23 = scalar_lea.vmem %s806_s4, 256  ;;  %s621_s16 = smov [#allocation7]  }
  0x5a   : > { %p544_p4 = scmp.ne.s32.totalorder %s806_s4, %s543_s23  ;;  %s547_s29 = sshll.u32 %s621_s16, 4  ;;  %s548_s29 = int_to_ptr.vmem [resolvable:$false] %s547_s29 }
  0x5b   : > { %414 = vmatpush3.bf16.msra.mxu0 %v483_v2  ;;  %s549_s30 = scalar_lea.vmem %s548_s29, 512  ;;  %p550_p10 = scmp.lt.s32.totalorder %s806_s4, %s548_s29 }
  0x5c   : > { %p545_p6 = pnand %p544_p4, %p738_p12  ;;  %p551_p13 = scmp.lt.s32.totalorder %s549_s30, %s543_s23 }
  0x5e   : > { %416 = vmatmul.mubr.msk.bf16.vlgmr.msra.gmra.mrb[0].mxu0 %vm237_vm1, %v484_v3  ;;  %p546_p8 = pneg %p545_p6  ;;  %p552_p3 = por %p551_p13, %p550_p10 }
  0x60   : > { %p553_p7 = pnand %p552_p3, %p546_p8 }
 0x131   : > { %v275_v5 = vpop.f32.mrb[0].mxu0 }
 0x132   : > { %v276_v6 = vadd.f32 %v396_v4, %v275_v5  ;;  %v417_v7 = vpop.f32.mrb[1].mxu0 }
 0x133   : > { %v278_v8 = vpop.f32.mrb[2].mxu0 }
 0x134   : > { %v282_v9 = vmax.f32 %v276_v6, 0.0  ;;  %v279_v10 = vadd.f32 %v396_v4, %v278_v8  ;;  %v418_v11 = vpop.f32.mrb[3].mxu0 }
 0x136   : > { %v284_v12 = vmin.f32 %v282_v9, 1.0  ;;  %v283_v13 = vmax.f32 %v279_v10, 0.0 }
 0x138   : > { %286 = vst [vmem:[%s203_s9] sm:$0xff] %v284_v12  ;;  %v285_v14 = vmin.f32 %v283_v13, 1.0 }
 0x13a   : > { %287 = vst [vmem:[%s203_s9 + $0x8] sm:$0xff] %v285_v14 }
 0x13b   : > { %556 = shalt.err (!%p553_p7)
}
 0x13c   : > { %s557_s22 = scalar_lea.hbm %s811_s27, 256  ;;  %s561_s11 = scalar_lea.hbm %s858_s3, 512 }
 0x13d   : > { %p558_p9 = scmp.ne.s32.totalorder %s811_s27, %s557_s22  ;;  %p562_p5 = scmp.lt.u32.totalorder %s811_s27, %s858_s3 }
 0x13e   : > { %p563_p2 = scmp.lt.u32.totalorder %s561_s11, %s557_s22  ;;  %p565_p4 = scmp.lt.u32.totalorder %s557_s22, %s811_s27 }
 0x13f   : > { %p559_p1 = pnand %p558_p9, %p738_p12 }
 0x140   : > { %p564_p11 = por %p563_p2, %p562_p5 }
 0x141   : > { %p560_p0 = pneg %p559_p1 }
 0x142   : > { %p566_p6 = por %p565_p4, %p564_p11 }
 0x144   : > { %p567_p8 = pnand %p566_p6, %p560_p0 }
 0x146   : > { %570 = shalt.err (!%p567_p8)
}
 0x147   : > { %s622_s8 = smov 128   ;;  %s623_s9 = smov 8  }
 0x148   : > { %425 = dma.vmem_to_hbm [thread:$0]  (%p738_p12), %s806_s4, 256, %s811_s27, %s289_s28, %s622_s8, %s622_s8, %s623_s9  }
 0x149 PF: > { %s317_s25 = sand.u32 1, %s601_s12   ;;  %p873_p10 = scmp.ne.s32.totalorder %s863_s19, 0 }
 0x14a   : > { %p874_p13 = scmp.ge.s32.totalorder %s613_s15, 2  ;;  %s318_s26 = scalar_lea.sflag [#allocation4], %s317_s25 }
 0x14c   : > { %p436_p3 = pnand %p874_p13, %p873_p10 }
 0x14e   : > { %596 = dma.done.wait (!%p436_p3), %s318_s26, 256  }
 0x14f   : > { %598 = vsyncadd (!%p436_p3), %s318_s26, 4294967040  ;;  %p17_p7 = scmp.ge.s32.totalorder %s700_s24, 4   ;;  %s875_s12 = smov %s605_s13 }
 0x150   : > { %s876_s13 = smov %s609_s14  ;;  %s877_s14 = smov %s734_s17 }
 0x151   : > { %s878_s15 = smov %s700_s24  ;;  %19 = sbr.rel (!%p17_p7) target bundleno = 6 (0x6), region = 81 }
 0x158   :  { %323 = vsyncpa [#allocation3], 1 }
 0x159   :  { %325 = vsyncpa [#allocation3 + $0x1], 1 }
 0x15a   :  { %326 = vsyncpa [#allocation6], 1 }
 0x15b   :  { %327 = vsyncpa [#allocation4], 1 }
 0x15c   :  { %329 = vsyncpa [#allocation4 + $0x1], 1 }

</bundles_post_ra>
